<compile_context>
chip_gen: v7x
topology: tpu7x:2x2x1
jax: 0.10.0
libtpu: 0.0.40
codegen_flags: <defaults>
</compile_context>

<pallas_src>
import functools

import jax
import jax.numpy as jnp
from jax import lax
from jax.experimental import pallas as pl
from jax.experimental.pallas import tpu as pltpu


def _soft_hist2d_w_kernel(x_ref, o_ref, *, sigma, delta, vmin, bins, W, Hc):
    # x_ref: (T, HC, L) VMEM block, L = Hc*W.  Row i holds original image rows
    #        [i*Hc, (i+1)*Hc) flattened so lane index = hh*W + w.
    # o_ref: (T, bins, W) VMEM block.
    T, HC, L = x_ref.shape
    binsp1 = bins + 1

    # Scaled bin edges on sublanes: arg_j(x) = sigma*edge_j - sigma*x,
    # edge_j = vmin + delta*j, j = 0..bins.  Built in-kernel (no per-step DMA)
    # and broadcast once (hoisted out of all loops).
    j = lax.broadcasted_iota(jnp.int32, (binsp1, 1), 0).astype(jnp.float32)
    scaled_edges = (sigma * delta) * j + (sigma * vmin)            # (binsp1, 1)
    edges_b = jnp.broadcast_to(scaled_edges, (binsp1, L))          # (binsp1, L)

    @pl.loop(0, T)
    def _slab(t):
        def h_body(i, acc):
            sx = x_ref[t, i].astype(jnp.float32) * sigma           # (L,)
            return acc + jax.nn.sigmoid(edges_b - sx[None, :])     # (binsp1, L)

        acc = lax.fori_loop(0, HC, h_body,
                            jnp.zeros((binsp1, L), jnp.float32),
                            unroll=True if HC <= 8 else 2)

        # Fold the Hc rows packed along lanes: A[j, w] = sum_hh acc[j, hh*W + w].
        A = acc[:, :W]
        for hh in range(1, Hc):
            A = A + acc[:, hh * W:(hh + 1) * W]                    # (binsp1, W)

        # hist[k, w] = A[k+1, w] - A[k, w]  (adjacent-edge difference, exact).
        o_ref[t, :, :] = (A[1:, :] - A[:-1, :]).astype(o_ref.dtype)


def _pick_h_chunk(H, W):
    """Rows packed into the lane dim so the sigmoid runs on >=128 lanes."""
    if W >= 128:
        return 1
    for hc in range(1, H + 1):
        if H % hc == 0 and hc * W >= 128:
            return hc
    return H  # H*W < 128: best we can do.


def _pick_slab_count(N, slab_bytes, max_block_bytes=2 << 20):
    """Largest divisor T of N with T*slab_bytes <= max and grid length >= 2."""
    best = 1
    for t in range(1, N + 1):
        if N % t != 0:
            continue
        if t * slab_bytes > max_block_bytes:
            continue
        if N >= 2 and N // t < 2:
            continue  # keep >=2 grid steps so both v7x TensorCores get work
        best = t
    return best


def soft_histogram2d_w(x, *, bins, vmin, vmax, sigma):
    """Pallas implementation of SoftHistogram2D_W.forward."""
    B, C, H, W = x.shape
    N = B * C
    delta = float(vmax - vmin) / float(bins)

    Hc = _pick_h_chunk(H, W)          # rows per lane-packed chunk
    HC = H // Hc                      # chunks per slab
    L = Hc * W                        # lane width of the sigmoid compute

    itemsize = jnp.dtype(x.dtype).itemsize
    slab_bytes = H * W * itemsize + W * bins * itemsize
    T = _pick_slab_count(N, slab_bytes)   # slabs per grid step (divides N)

    # Free, contiguous reshape: (N, H, W) -> (N, HC, Hc*W).
    x2 = x.reshape(N, HC, L)

    kernel = functools.partial(
        _soft_hist2d_w_kernel, sigma=float(sigma), delta=delta,
        vmin=float(vmin), bins=int(bins), W=W, Hc=Hc)

    out = pl.pallas_call(
        kernel,
        out_shape=jax.ShapeDtypeStruct((N, bins, W), x.dtype),
        grid_spec=pltpu.PrefetchScalarGridSpec(
            num_scalar_prefetch=0,
            grid=(N // T,),
            in_specs=[pl.BlockSpec((T, HC, L), lambda n: (n, 0, 0))],
            out_specs=pl.BlockSpec((T, bins, W), lambda n: (n, 0, 0)),
        ),
        compiler_params=pltpu.CompilerParams(
            dimension_semantics=("parallel",)),
    )(x2)

    # Layout plumbing only: (N, bins, W) -> (B, C, W, bins).
    return jnp.swapaxes(out.reshape(B, C, bins, W), -1, -2)


def soft_histogram2d_w_ref(x, *, bins, vmin, vmax, sigma):
    """Pure-JAX reference mirroring the PyTorch code path."""
    delta = float(vmax - vmin) / float(bins)
    centers = float(vmin) + delta * (jnp.arange(bins, dtype=jnp.float32) + 0.5)
    x_ = jnp.swapaxes(x, -1, -2)                                      # (B, C, W, H)
    diff = centers[None, None, None, :, None] - x_[:, :, :, None, :]  # (B,C,W,bins,H)
    val = jax.nn.sigmoid(sigma * (diff + 0.5 * delta)) \
        - jax.nn.sigmoid(sigma * (diff - 0.5 * delta))
    return val.sum(axis=-1)                                           # (B, C, W, bins)


if __name__ == "__main__":
    B, C, H, W = 2, 4, 16, 16
    BINS = 32
    VMIN, VMAX = 0.0, 1.0
    SIGMA = 25.0

    key = jax.random.PRNGKey(0)
    x = jax.random.uniform(key, (B, C, H, W), dtype=jnp.float32,
                           minval=VMIN, maxval=VMAX)

    out = soft_histogram2d_w(x, bins=BINS, vmin=VMIN, vmax=VMAX, sigma=SIGMA)
    out = jax.block_until_ready(out)

    ref = soft_histogram2d_w_ref(x, bins=BINS, vmin=VMIN, vmax=VMAX, sigma=SIGMA)
    assert out.shape == (B, C, W, BINS), out.shape
    assert jnp.allclose(out, ref, atol=1e-4, rtol=1e-4), \
        f"max abs err = {jnp.max(jnp.abs(out - ref))}"

    print("KERNEL_OK")
</pallas_src>

<mosaic_0001>
module attributes {stable_mosaic.version = 11 : i64} {
  func.func @_soft_hist2d_w_kernel(%arg0: i32, %arg1: memref<4x2x128xf32, #tpu.memory_space<vmem>>, %arg2: memref<4x32x16xf32, #tpu.memory_space<vmem>>) attributes {dimension_semantics = [#tpu.dimension_semantics<parallel>], iteration_bounds = array<i64: 2>, scalar_prefetch = 0 : i64, scratch_operands = 0 : i64, tpu.core_type = #tpu.core_type<tc>, window_params = [{transform_indices = @transform_0, window_bounds = array<i64: 4, 2, 128>}, {transform_indices = @transform_1, window_bounds = array<i64: 4, 32, 16>}]} {
    %0 = tpu.iota {dimensions = array<i32: 0>} : vector<33x1xi32>
    %1 = arith.sitofp %0 : vector<33x1xi32> to vector<33x1xf32>
    %cst = arith.constant 7.812500e-01 : f32
    %2 = vector.broadcast %cst : f32 to vector<33x1xf32>
    %3 = arith.mulf %2, %1 : vector<33x1xf32>
    %cst_0 = arith.constant 0.000000e+00 : f32
    %4 = vector.broadcast %cst_0 : f32 to vector<33x1xf32>
    %5 = arith.addf %3, %4 : vector<33x1xf32>
    %6 = vector.shape_cast %5 : vector<33x1xf32> to vector<33x1xf32>
    %7 = vector.broadcast %6 : vector<33x1xf32> to vector<33x128xf32>
    %c0_i32 = arith.constant 0 : i32
    %c4_i32 = arith.constant 4 : i32
    %8 = arith.addi %c0_i32, %c4_i32 : i32
    %c1_i32 = arith.constant 1 : i32
    scf.for %arg3 = %c0_i32 to %8 step %c1_i32  : i32 {
      %c1_i32_2 = arith.constant 1 : i32
      %9 = arith.muli %arg3, %c1_i32_2 : i32
      %c0_i32_3 = arith.constant 0 : i32
      %10 = arith.addi %c0_i32_3, %9 : i32
      %cst_4 = arith.constant 0.000000e+00 : f32
      %11 = vector.broadcast %cst_4 : f32 to vector<33x128xf32>
      %c0_i32_5 = arith.constant 0 : i32
      %12 = arith.index_cast %10 : i32 to index
      %13 = arith.index_cast %c0_i32_5 : i32 to index
      %c0 = arith.constant 0 : index
      %14 = vector.load %arg1[%12, %13, %c0] : memref<4x2x128xf32, #tpu.memory_space<vmem>>, vector<1x1x128xf32>
      %15 = vector.shape_cast %14 : vector<1x1x128xf32> to vector<128xf32>
      %cst_6 = arith.constant 2.500000e+01 : f32
      %16 = vector.broadcast %cst_6 : f32 to vector<128xf32>
      %17 = arith.mulf %15, %16 : vector<128xf32>
      %18 = vector.shape_cast %17 : vector<128xf32> to vector<1x128xf32>
      %19 = vector.broadcast %18 : vector<1x128xf32> to vector<33x128xf32>
      %20 = arith.subf %7, %19 : vector<33x128xf32>
      %21 = arith.negf %20 : vector<33x128xf32>
      %22 = math.exp %21 : vector<33x128xf32>
      %cst_7 = arith.constant 1.000000e+00 : f32
      %23 = vector.broadcast %cst_7 : f32 to vector<33x128xf32>
      %24 = arith.addf %23, %22 : vector<33x128xf32>
      %25 = arith.divf %23, %24 : vector<33x128xf32>
      %26 = arith.addf %11, %25 : vector<33x128xf32>
      %c1_i32_8 = arith.constant 1 : i32
      %27 = arith.index_cast %10 : i32 to index
      %28 = arith.index_cast %c1_i32_8 : i32 to index
      %c0_9 = arith.constant 0 : index
      %29 = vector.load %arg1[%27, %28, %c0_9] : memref<4x2x128xf32, #tpu.memory_space<vmem>>, vector<1x1x128xf32>
      %30 = vector.shape_cast %29 : vector<1x1x128xf32> to vector<128xf32>
      %cst_10 = arith.constant 2.500000e+01 : f32
      %31 = vector.broadcast %cst_10 : f32 to vector<128xf32>
      %32 = arith.mulf %30, %31 : vector<128xf32>
      %33 = vector.shape_cast %32 : vector<128xf32> to vector<1x128xf32>
      %34 = vector.broadcast %33 : vector<1x128xf32> to vector<33x128xf32>
      %35 = arith.subf %7, %34 : vector<33x128xf32>
      %36 = arith.negf %35 : vector<33x128xf32>
      %37 = math.exp %36 : vector<33x128xf32>
      %cst_11 = arith.constant 1.000000e+00 : f32
      %38 = vector.broadcast %cst_11 : f32 to vector<33x128xf32>
      %39 = arith.addf %38, %37 : vector<33x128xf32>
      %40 = arith.divf %38, %39 : vector<33x128xf32>
      %41 = arith.addf %26, %40 : vector<33x128xf32>
      %c2_i32 = arith.constant 2 : i32
      %42 = vector.extract_strided_slice %41 {offsets = [0, 0], sizes = [33, 16], strides = [1, 1]} : vector<33x128xf32> to vector<33x16xf32>
      %43 = vector.extract_strided_slice %41 {offsets = [0, 16], sizes = [33, 16], strides = [1, 1]} : vector<33x128xf32> to vector<33x16xf32>
      %44 = arith.addf %42, %43 : vector<33x16xf32>
      %45 = vector.extract_strided_slice %41 {offsets = [0, 32], sizes = [33, 16], strides = [1, 1]} : vector<33x128xf32> to vector<33x16xf32>
      %46 = arith.addf %44, %45 : vector<33x16xf32>
      %47 = vector.extract_strided_slice %41 {offsets = [0, 48], sizes = [33, 16], strides = [1, 1]} : vector<33x128xf32> to vector<33x16xf32>
      %48 = arith.addf %46, %47 : vector<33x16xf32>
      %49 = vector.extract_strided_slice %41 {offsets = [0, 64], sizes = [33, 16], strides = [1, 1]} : vector<33x128xf32> to vector<33x16xf32>
      %50 = arith.addf %48, %49 : vector<33x16xf32>
      %51 = vector.extract_strided_slice %41 {offsets = [0, 80], sizes = [33, 16], strides = [1, 1]} : vector<33x128xf32> to vector<33x16xf32>
      %52 = arith.addf %50, %51 : vector<33x16xf32>
      %53 = vector.extract_strided_slice %41 {offsets = [0, 96], sizes = [33, 16], strides = [1, 1]} : vector<33x128xf32> to vector<33x16xf32>
      %54 = arith.addf %52, %53 : vector<33x16xf32>
      %55 = vector.extract_strided_slice %41 {offsets = [0, 112], sizes = [33, 16], strides = [1, 1]} : vector<33x128xf32> to vector<33x16xf32>
      %56 = arith.addf %54, %55 : vector<33x16xf32>
      %57 = vector.extract_strided_slice %56 {offsets = [1, 0], sizes = [32, 16], strides = [1, 1]} : vector<33x16xf32> to vector<32x16xf32>
      %58 = vector.extract_strided_slice %56 {offsets = [0, 0], sizes = [32, 16], strides = [1, 1]} : vector<33x16xf32> to vector<32x16xf32>
      %59 = arith.subf %57, %58 : vector<32x16xf32>
      %60 = arith.index_cast %10 : i32 to index
      %c0_12 = arith.constant 0 : index
      %c0_13 = arith.constant 0 : index
      %61 = vector.load %arg2[%60, %c0_12, %c0_13] : memref<4x32x16xf32, #tpu.memory_space<vmem>>, vector<1x32x16xf32>
      %62 = vector.shape_cast %61 : vector<1x32x16xf32> to vector<32x16xf32>
      %63 = vector.shape_cast %59 : vector<32x16xf32> to vector<1x32x16xf32>
      tpu.vector_store %arg2[%60, %c0_12, %c0_13], %63 {strides = array<i32>} : memref<4x32x16xf32, #tpu.memory_space<vmem>>, vector<1x32x16xf32>,
    }
    %c4_i32_1 = arith.constant 4 : i32
    return
  }
  func.func @transform_0(%arg0: i32) -> (i32, i32, i32) {
    %c0_i32 = arith.constant 0 : i32
    %c0_i32_0 = arith.constant 0 : i32
    %c0_i32_1 = arith.constant 0 : i32
    return %arg0, %c0_i32, %c0_i32_0 : i32, i32, i32
  }
  func.func @transform_1(%arg0: i32) -> (i32, i32, i32) {
    %c0_i32 = arith.constant 0 : i32
    %c0_i32_0 = arith.constant 0 : i32
    %c0_i32_1 = arith.constant 0 : i32
    return %arg0, %c0_i32, %c0_i32_0 : i32, i32, i32
  }
}

</mosaic_0001>

<bundles_post_ra>
// kernel: tpu_custom_call.1
= control target key start
LH: loop header
LB: loop body
LE: loop exit
PB: predicated region body
PF: predicated region fallthrough
CT: control target
= control target key end

     0   :  { %6 = vsyncpa [#allocation3], 0  ;;  %s951_s0 = inlined_call_operand.hbm [shape: f32[8,2,128], index: 0, kind: input, shape index: {}]   ;;  %s952_s1 = inlined_call_operand.vmem [shape: f32[8,32,16], index: 1, kind: output, shape index: {}]  }
   0x1   :  { %8 = vsyncpa [#allocation3 + $0x1], 0  ;;  %s735_s6 = smov 0   ;;  %s737_s7 = smov 0  }
   0x2   :  { %s739_s8 = smov 0   ;;  %s741_s9 = smov 0  }
   0x3 LB: > { %s517_s10 = sadd.s32 4294967295, %s709_s9   ;;  %s755_s11 = sadd.s32 1, %s709_s9   ;;  %s709_s9 = sphi %s741_s9, %s959_s9   ;;  %s705_s8 = sphi %s739_s8, %s958_s8   ;;  %s701_s7 = sphi %s737_s7, %s957_s7   ;;  %s697_s6 = sphi %s735_s6, %s956_s6  }
   0x4   : > { %s18_s12 = ssub.s32 %s709_s9, %s755_s11  ;;  %s21_s13 = sadd.s32 1, %s705_s8 }
   0x5   : > { %p19_p0 = scmp.eq.s32.totalorder %s18_s12, 0  ;;  %p28_p1 = scmp.ne.s32.totalorder %s705_s8, %s701_s7 }
   0x6   : > { %p29_p2 = scmp.eq.s32.totalorder %s709_s9, 0  ;;  %p34_p3 = scmp.ne.s32.totalorder %s701_s7, %s697_s6 }
   0x7   : > { %s765_s14 = scalar_select %p19_p0, %s705_s8, %s21_s13  }
   0x8   : > { %p30_p4 = por %p29_p2, %p28_p1  ;;  %p35_p5 = scmp.eq.s32.totalorder %s517_s10, 0 }
   0x9   : > { %p551_p6 = scmp.lt.s32.totalorder %s709_s9, 2  ;;  %s84_s16 = sand.u32 1, %s705_s8  }
   0xa   : > { %p770_p7 = por %p35_p5, %p34_p3  ;;  %s521_s17 = sshll.u32 %s84_s16, 3 }
   0xb   : > { %s543_s18 = sshll.u32 %s709_s9, 7  ;;  %s88_s22 = scalar_lea.vmem [#allocation2], %s521_s17 }
   0xc   : > { %s779_s21 = scalar_lea.hbm %s951_s0, %s543_s18  ;;  %s95_s23 = sshll.u32 %s88_s22, 4  ;;  %s781_s23 = int_to_ptr.vmem [resolvable:$true] %s95_s23 }
   0xd   : > { %p783_p8 = pnand %p551_p6, %p30_p4  ;;  %s788_s25 = scalar_lea.sflag [#allocation3], %s84_s16 }
   0xe   : > { %s641_s26 = scalar_lea.hbm %s779_s21, 128  ;;  %s646_s29 = scalar_lea.hbm %s951_s0, 256 }
   0xf   : > { %p642_p10 = scmp.ne.s32.totalorder %s779_s21, %s641_s26  ;;  %p643_p11 = pneg %p783_p8 }
  0x10   : > { %p647_p0 = scmp.lt.u32.totalorder %s779_s21, %s951_s0  ;;  %p648_p1 = scmp.lt.u32.totalorder %s646_s29, %s641_s26 }
  0x11   : > { %p644_p12 = pnand %p643_p11, %p642_p10  ;;  %p650_p3 = scmp.lt.u32.totalorder %s641_s26, %s779_s21 }
  0x12   : > { %p649_p2 = por %p648_p1, %p647_p0 }
  0x13   : > { %p645_p13 = pneg %p644_p12 }
  0x14   : > { %p651_p4 = por %p650_p3, %p649_p2 }
  0x16   : > { %p652_p5 = pnand %p651_p4, %p645_p13 }
  0x18   : > { %655 = shalt.err (!%p652_p5)
}
  0x19   : > { %s656_s3 = scalar_lea.vmem %s781_s23, 128  ;;  %s715_s4 = smov [#allocation2]  }
  0x1a   : > { %p657_p6 = scmp.ne.s32.totalorder %s781_s23, %s656_s3  ;;  %s661_s5 = sshll.u32 %s715_s4, 4  ;;  %s662_s5 = int_to_ptr.vmem [resolvable:$false] %s661_s5 }
  0x1b   : > { %s663_s6 = scalar_lea.vmem %s662_s5, 256  ;;  %p664_p9 = scmp.lt.s32.totalorder %s781_s23, %s662_s5 }
  0x1c   : > { %p659_p10 = pnand %p657_p6, %p643_p11  ;;  %p665_p0 = scmp.lt.s32.totalorder %s663_s6, %s656_s3 }
  0x1e   : > { %p660_p12 = pneg %p659_p10  ;;  %p666_p1 = por %p665_p0, %p664_p9 }
  0x20   : > { %p667_p2 = pnand %p666_p1, %p660_p12 }
  0x22   : > { %670 = shalt.err (!%p667_p2)
}
  0x23   : > { %s716_s12 = smov 32   ;;  %s717_s13 = smov 2  }
  0x24   : > { %550 = dma.hbm_to_vmem [thread:$0]  (!%p783_p8), %s779_s21, 128, %s781_s23, %s788_s25, %s716_s12, %s716_s12, %s717_s13  }
  0x25   : > { %p103_p11 = scmp.lt.s32.totalorder %s709_s9, 3  ;;  %p955_p13 = scmp.ge.s32.totalorder %s709_s9, 1 }
  0x27   : > { %p104_p3 = pnand %p955_p13, %p103_p11 }
  0x28   : > { %s109_s16 = sand.u32 (!%p104_p3), 1, %s701_s7  }
  0x29   : > { %107 = sbr.rel (%p104_p3) target bundleno = 286 (0x11e), region = 24  ;;  %s820_s17 = sshll.u32 (!%p104_p3), %s109_s16, 3 }
  0x2a   : > { %s110_s18 = scalar_lea.sflag (!%p104_p3), [#allocation3], %s109_s16  ;;  %s113_s19 = scalar_lea.vmem (!%p104_p3), [#allocation2], %s820_s17 }
  0x30   : > { %692 = dma.done.wait (%p770_p7), %s110_s18, 128  }
  0x31   : > { %694 = vsyncadd (%p770_p7), %s110_s18, 4294967168  ;;  %s526_s20 = sshll.u32 %s517_s10, 2  ;;  %v141_v0 = vlaneseq  ;;  %s851_s10 = smov 0  }
  0x32   : > { %p135_p8 = scmp.lt.s32.totalorder %s526_s20, 7 }
  0x33   : > { %v829_v1 = vshrl.u32 %v141_v0, 7 }
  0x34   : > { %s961_s20 = smov (!%p135_p8, %s526_s20), 7 }
  0x35   : > { %v143_v2 = vadd.s32 8, %v829_v1  ;;  %v144_v3 = vadd.s32 16, %v829_v1  ;;  %v145_v4 = vadd.s32 24, %v829_v1  ;;  %v146_v5 = vadd.s32 32, %v829_v1  ;;  %s544_s21 = sshll.u32 %s961_s20, 5 }
  0x36   : > { %v147_v6 = vcvt.s32.f32 %v829_v1  ;;  %s839_s9 = scalar_lea.vmem %s952_s1, %s544_s21 }
  0x37   : > { %v148_v7 = vcvt.s32.f32 %v143_v2  ;;  %v149_v8 = vcvt.s32.f32 %v144_v3  ;;  %v150_v9 = vcvt.s32.f32 %v145_v4  ;;  %v151_v10 = vcvt.s32.f32 %v146_v5 }
  0x38   : > { %v841_v11 = vmul.f32 0.78125, %v147_v6 }
  0x39   : > { %v843_v12 = vmul.f32 0.78125, %v148_v7  ;;  %v845_v13 = vmul.f32 0.78125, %v149_v8  ;;  %v847_v14 = vmul.f32 0.78125, %v150_v9  ;;  %v849_v15 = vmul.f32 0.78125, %v151_v10 }
  0x3a LB: >> { %s529_s23 = sshll.u32 %s713_s10, 1  ;;  %v174_v16 = vsub.s32 0, %v829_v1  ;;  %s718_s25 = smov 112   ;;  %vm431_vm0 = vcmask 130049   ;;  %vm411_vm1 = vcmask 1040384   ;;  %vm433_vm2 = vcmask 130048   ;;  %s713_s10 = sphi %s851_s10, %s167_s10  }
  0x3b   : >> { %s169_s24 = scalar_lea.vmem %s113_s19, %s529_s23 [#allocation2]  ;;  %s719_s26 = smov 96   ;;  %vm437_vm3 = vcmask 122880  }
  0x3c   : >> { %v170_v17 = vld [vmem:[%s169_s24] sm:$0x1]  ;;  %v216_v18 = vld [vmem:[%s169_s24 + $0x1] sm:$0x1]  ;;  %s720_s27 = smov 80   ;;  %s721_s28 = smov 64  }
  0x3d   : >> { %v171_v19 = vmul.f32 25.0, %v170_v17  ;;  %v217_v20 = vmul.f32 25.0, %v216_v18  ;;  %s722_s29 = smov 48   ;;  %s723_s30 = smov 32  }
  0x3e   : >> { %s724_s2 = smov 16   ;;  %s540_s3 = sshll.u32 %s713_s10, 5 }
  0x3f   : >> { %v175_v21 = vrot.slane %v171_v19, %v174_v16  ;;  %v221_v22 = vrot.slane %v217_v20, %v174_v16  ;;  %s922_s4 = scalar_lea.vmem %s839_s9, %s540_s3  ;;  %s167_s10 = sadd.s32 1, %s713_s10  }
  0x40   : >> { %p164_p7 = scmp.ge.s32.totalorder %s167_s10, 4  }
  0x41   : >> { %v178_v23 = vsub.f32 %v845_v13, %v175_v21  ;;  %v224_v24 = vsub.f32 %v845_v13, %v221_v22  ;;  %v176_v25 = vsub.f32 %v841_v11, %v175_v21  ;;  %v222_v26 = vsub.f32 %v841_v11, %v221_v22 }
  0x42   : >> { %v179_v27 = vsub.f32 %v847_v14, %v175_v21  ;;  %v225_v28 = vsub.f32 %v847_v14, %v221_v22  ;;  %v177_v32 = vsub.f32 %v843_v12, %v175_v21  ;;  %v223_v34 = vsub.f32 %v843_v12, %v221_v22 }
  0x43   : >> { %v532_v29 = vmul.f32 -1.442695, %v178_v23  ;;  %v537_v30 = vmul.f32 -1.442695, %v224_v24  ;;  %v530_v31 = vmul.f32 -1.442695, %v176_v25  ;;  %v180_v38 = vsub.f32 %v849_v15, %v175_v21 }
  0x44   : >> { %v535_v33 = vmul.f32 -1.442695, %v222_v26  ;;  %v533_v35 = vmul.f32 -1.442695, %v179_v27  ;;  %v538_v36 = vmul.f32 -1.442695, %v225_v28  ;;  %v226_v40 = vsub.f32 %v849_v15, %v221_v22 }
  0x45   : >> { %601 = vpow2.f32 %v532_v29  ;;  %v531_v37 = vmul.f32 -1.442695, %v177_v32  ;;  %v536_v39 = vmul.f32 -1.442695, %v223_v34  ;;  %v534_v41 = vmul.f32 -1.442695, %v180_v38 }
  0x46   : >> { %603 = vpow2.f32 %v537_v30  ;;  %v539_v42 = vmul.f32 -1.442695, %v226_v40 }
  0x47   : >> { %605 = vpow2.f32 %v530_v31 }
  0x48   : >> { %607 = vpow2.f32 %v535_v33 }
  0x49   : >> { %609 = vpow2.f32 %v533_v35 }
  0x4a   : >> { %611 = vpow2.f32 %v538_v36 }
  0x4b   : >> { %613 = vpow2.f32 %v531_v37 }
  0x4c   : >> { %615 = vpow2.f32 %v536_v39 }
  0x4d   : >> { %617 = vpow2.f32 %v534_v41 }
  0x4e   : >> { %619 = vpow2.f32 %v539_v42 }
  0x4f   : >> { %v602_v43 = vpop.eup %601 }
  0x50   : >> { %v604_v44 = vpop.eup %603  ;;  %v198_v45 = vadd.f32 1.0, %v602_v43 }
  0x51   : >> { %v606_v46 = vpop.eup %605  ;;  %v244_v47 = vadd.f32 1.0, %v604_v44 }
  0x52   : >> { %v608_v48 = vpop.eup %607  ;;  %621 = vrcp.f32 %v198_v45  ;;  %v196_v49 = vadd.f32 1.0, %v606_v46 }
  0x53   : >> { %v610_v50 = vpop.eup %609  ;;  %623 = vrcp.f32 %v244_v47  ;;  %v242_v51 = vadd.f32 1.0, %v608_v48 }
  0x54   : >> { %v612_v52 = vpop.eup %611  ;;  %625 = vrcp.f32 %v196_v49  ;;  %v199_v53 = vadd.f32 1.0, %v610_v50 }
  0x55   : >> { %v614_v54 = vpop.eup %613  ;;  %627 = vrcp.f32 %v242_v51  ;;  %v245_v55 = vadd.f32 1.0, %v612_v52 }
  0x56   : >> { %v616_v56 = vpop.eup %615  ;;  %629 = vrcp.f32 %v199_v53  ;;  %v197_v57 = vadd.f32 1.0, %v614_v54 }
  0x57   : >> { %631 = vrcp.f32 %v245_v55  ;;  %v243_v58 = vadd.f32 1.0, %v616_v56  ;;  %v618_v59 = vpop.eup %617 }
  0x58   : >> { %633 = vrcp.f32 %v197_v57  ;;  %v620_v60 = vpop.eup %619  ;;  %v200_v62 = vadd.f32 1.0, %v618_v59 }
  0x59   : >> { %635 = vrcp.f32 %v243_v58  ;;  %v246_v0 = vadd.f32 1.0, %v620_v60 }
  0x5a   : >> { %637 = vrcp.f32 %v200_v62 }
  0x5b   : >> { %639 = vrcp.f32 %v246_v0 }
  0x5c   : >> { %v622_v61 = vpop.eup %621 }
  0x5d   : >> { %v624_v63 = vpop.eup %623 }
  0x5e   : >> { %v626_v2 = vpop.eup %625  ;;  %v870_v3 = vadd.f32 %v624_v63, %v622_v61 }
  0x5f   : >> { %v628_v4 = vpop.eup %627 }
  0x60   : >> { %v630_v5 = vpop.eup %629  ;;  %271 = vrot.lane.b32.xlu1 %v870_v3, %s718_s25  ;;  %v873_v6 = vadd.f32 %v628_v4, %v626_v2 }
  0x61   : >> { %v632_v7 = vpop.eup %631 }
  0x62   : >> { %v634_v8 = vpop.eup %633  ;;  %267 = vrot.lane.b32.xlu0 %v873_v6, %s718_s25  ;;  %v876_v9 = vadd.f32 %v632_v7, %v630_v5 }
  0x63   : >> { %v636_v10 = vpop.eup %635 }
  0x64   : >> { %273 = vrot.lane.b32.xlu1 %v876_v9, %s718_s25  ;;  %v879_v16 = vadd.f32 %v636_v10, %v634_v8  ;;  %v638_v17 = vpop.eup %637 }
  0x65   : >> { %v640_v18 = vpop.eup %639 }
  0x66   : >> { %269 = vrot.lane.b32.xlu0 %v879_v16, %s718_s25  ;;  %v886_v19 = vadd.f32 %v640_v18, %v638_v17 }
  0x68   : >> { %289 = vrot.lane.b32.xlu1 %v879_v16, %s719_s26 }
  0x6a   : >> { %287 = vrot.lane.b32.xlu0 %v873_v6, %s719_s26 }
  0x6c   : >> { %293 = vrot.lane.b32.xlu1 %v876_v9, %s719_s26 }
  0x6e   : >> { %291 = vrot.lane.b32.xlu0 %v870_v3, %s719_s26 }
  0x70   : >> { %307 = vrot.lane.b32.xlu1 %v873_v6, %s720_s27 }
  0x72   : >> { %275 = vrot.lane.b32.xlu0 %v886_v19, %s718_s25 }
  0x74   : >> { %311 = vrot.lane.b32.xlu1 %v870_v3, %s720_s27 }
  0x76   : >> { %309 = vrot.lane.b32.xlu0 %v879_v16, %s720_s27 }
  0x78   : >> { %295 = vrot.lane.b32.xlu1 %v886_v19, %s719_s26 }
  0x7a   : >> { %313 = vrot.lane.b32.xlu0 %v876_v9, %s720_s27 }
  0x7c   : >> { %329 = vrot.lane.b32.xlu1 %v879_v16, %s721_s28 }
  0x7e   : >> { %327 = vrot.lane.b32.xlu0 %v873_v6, %s721_s28 }
  0x80   : >> { %333 = vrot.lane.b32.xlu1 %v876_v9, %s721_s28 }
  0x82   : >> { %331 = vrot.lane.b32.xlu0 %v870_v3, %s721_s28 }
  0x84   : >> { %347 = vrot.lane.b32.xlu1 %v873_v6, %s722_s29 }
  0x86   : >> { %315 = vrot.lane.b32.xlu0 %v886_v19, %s720_s27 }
  0x88   : >> { %351 = vrot.lane.b32.xlu1 %v870_v3, %s722_s29 }
  0x8a   : >> { %349 = vrot.lane.b32.xlu0 %v879_v16, %s722_s29 }
  0x8c   : >> { %335 = vrot.lane.b32.xlu1 %v886_v19, %s721_s28 }
  0x8e   : >> { %353 = vrot.lane.b32.xlu0 %v876_v9, %s722_s29 }
  0x90   : >> { %369 = vrot.lane.b32.xlu1 %v879_v16, %s723_s30 }
  0x92   : >> { %367 = vrot.lane.b32.xlu0 %v873_v6, %s723_s30 }
  0x94   : >> { %373 = vrot.lane.b32.xlu1 %v876_v9, %s723_s30 }
  0x96   : >> { %371 = vrot.lane.b32.xlu0 %v870_v3, %s723_s30 }
  0x98   : >> { %387 = vrot.lane.b32.xlu1 %v873_v6, %s724_s2 }
  0x9a   : >> { %355 = vrot.lane.b32.xlu0 %v886_v19, %s722_s29 }
  0x9c   : >> { %391 = vrot.lane.b32.xlu1 %v870_v3, %s724_s2 }
  0x9e   : >> { %389 = vrot.lane.b32.xlu0 %v879_v16, %s724_s2 }
  0xa0   : >> { %375 = vrot.lane.b32.xlu1 %v886_v19, %s723_s30 }
  0xa2   : >> { %393 = vrot.lane.b32.xlu0 %v876_v9, %s724_s2 }
  0xa6   : >> { %395 = vrot.lane.b32.xlu0 %v886_v19, %s724_s2 }
  0xd2   : >> { %v272_v20 = vpop.permute.xlu1 %271 }
  0xd3   : >> { %v284_v47 = vadd.f32 %v272_v20, %v870_v3 }
  0xd4   : >> { %v268_v21 = vpop.permute.xlu0 %267 }
  0xd5   : >> { %v282_v43 = vadd.f32 %v268_v21, %v873_v6 }
  0xd6   : >> { %v274_v22 = vpop.permute.xlu1 %273 }
  0xd7   : >> { %v285_v58 = vadd.f32 %v274_v22, %v876_v9 }
  0xd8   : >> { %v270_v23 = vpop.permute.xlu0 %269 }
  0xd9   : >> { %v283_v50 = vadd.f32 %v270_v23, %v879_v16 }
  0xda   : >> { %v290_v24 = vpop.permute.xlu1 %289 }
  0xdb   : >> { %v303_v54 = vadd.f32 %v290_v24, %v283_v50 }
  0xdc   : >> { %v288_v25 = vpop.permute.xlu0 %287 }
  0xdd   : >> { %v302_v45 = vadd.f32 %v288_v25, %v282_v43 }
  0xde   : >> { %v294_v26 = vpop.permute.xlu1 %293 }
  0xdf   : >> { %v305_v63 = vadd.f32 %v294_v26, %v285_v58 }
  0xe0   : >> { %v292_v27 = vpop.permute.xlu0 %291 }
  0xe1   : >> { %v304_v51 = vadd.f32 %v292_v27, %v284_v47 }
  0xe2   : >> { %v308_v28 = vpop.permute.xlu1 %307 }
  0xe3   : >> { %v322_v48 = vadd.f32 %v308_v28, %v302_v45 }
  0xe4   : >> { %v276_v29 = vpop.permute.xlu0 %275 }
  0xe5   : >> { %v286_v4 = vadd.f32 %v276_v29, %v886_v19 }
  0xe6   : >> { %v312_v30 = vpop.permute.xlu1 %311 }
  0xe7   : >> { %v324_v55 = vadd.f32 %v312_v30, %v304_v51 }
  0xe8   : >> { %v310_v31 = vpop.permute.xlu0 %309 }
  0xe9   : >> { %v323_v59 = vadd.f32 %v310_v31, %v303_v54 }
  0xea   : >> { %v296_v32 = vpop.permute.xlu1 %295 }
  0xeb   : >> { %v306_v16 = vadd.f32 %v296_v32, %v286_v4 }
  0xec   : >> { %v314_v33 = vpop.permute.xlu0 %313 }
  0xed   : >> { %v325_v6 = vadd.f32 %v314_v33, %v305_v63 }
  0xee   : >> { %v330_v34 = vpop.permute.xlu1 %329 }
  0xef   : >> { %v343_v0 = vadd.f32 %v330_v34, %v323_v59 }
  0xf0   : >> { %v328_v35 = vpop.permute.xlu0 %327 }
  0xf1   : >> { %v342_v52 = vadd.f32 %v328_v35, %v322_v48 }
  0xf2   : >> { %v334_v36 = vpop.permute.xlu1 %333 }
  0xf3   : >> { %v345_v17 = vadd.f32 %v334_v36, %v325_v6 }
  0xf4   : >> { %v332_v37 = vpop.permute.xlu0 %331 }
  0xf5   : >> { %v344_v60 = vadd.f32 %v332_v37, %v324_v55 }
  0xf6   : >> { %v348_v38 = vpop.permute.xlu1 %347 }
  0xf7   : >> { %v362_v56 = vadd.f32 %v348_v38, %v342_v52 }
  0xf8   : >> { %v316_v39 = vpop.permute.xlu0 %315 }
  0xf9   : >> { %v326_v23 = vadd.f32 %v316_v39, %v306_v16 }
  0xfa   : >> { %v352_v40 = vpop.permute.xlu1 %351 }
  0xfb   : >> { %v364_v2 = vadd.f32 %v352_v40, %v344_v60 }
  0xfc   : >> { %v350_v41 = vpop.permute.xlu0 %349 }
  0xfd   : >> { %v363_v7 = vadd.f32 %v350_v41, %v343_v0 }
  0xfe   : >> { %v336_v42 = vpop.permute.xlu1 %335 }
  0xff   : >> { %v346_v26 = vadd.f32 %v336_v42, %v326_v23 }
 0x100   : >> { %v354_v44 = vpop.permute.xlu0 %353 }
 0x101   : >> { %v365_v24 = vadd.f32 %v354_v44, %v345_v17 }
 0x102   : >> { %v370_v46 = vpop.permute.xlu1 %369 }
 0x103   : >> { %v383_v18 = vadd.f32 %v370_v46, %v363_v7 }
 0x104   : >> { %v368_v49 = vpop.permute.xlu0 %367 }
 0x105   : >> { %v382_v61 = vadd.f32 %v368_v49, %v362_v56 }
 0x106   : >> { %v374_v53 = vpop.permute.xlu1 %373 }
 0x107   : >> { %v385_v27 = vadd.f32 %v374_v53, %v365_v24 }
 0x108   : >> { %v372_v57 = vpop.permute.xlu0 %371 }
 0x109   : >> { %v384_v8 = vadd.f32 %v372_v57, %v364_v2 }
 0x10a   : >> { %v388_v62 = vpop.permute.xlu1 %387 }
 0x10b   : >> { %v402_v3 = vadd.f32 %v388_v62, %v382_v61 }
 0x10c   : >> { %v356_v5 = vpop.permute.xlu0 %355 }
 0x10d   : >> { %v412_v10 = vrot.slane %v402_v3, 7  ;;  %v366_v31 = vadd.f32 %v356_v5, %v346_v26 }
 0x10e   : >> { %v392_v9 = vpop.permute.xlu1 %391 }
 0x10f   : >> { %v424_v20 = vsub.f32 %v402_v3, %v412_v10  ;;  %v404_v21 = vadd.f32 %v392_v9, %v384_v8 }
 0x110   : >> { %v390_v22 = vpop.permute.xlu0 %389 }
 0x111   : >> { %432 = vst.msk [vmem:[%s922_s4 - $0x1] sm:$0xfe] %vm431_vm0, %v424_v20  ;;  %v415_v19 = vrot.slane %v404_v21, 7  ;;  %v403_v25 = vadd.f32 %v390_v22, %v383_v18 }
 0x112   : >> { %v376_v29 = vpop.permute.xlu1 %375 }
 0x113   : >> { %v413_v28 = vrot.slane %v403_v25, 7  ;;  %v386_v37 = vadd.f32 %v376_v29, %v366_v31 }
 0x114   : >> { %v394_v30 = vpop.permute.xlu0 %393 }
 0x115   : >> { %v414_v32 = vsel %vm411_vm1, %v412_v10, %v413_v28  ;;  %v416_v33 = vsel %vm411_vm1, %v413_v28, %v415_v19  ;;  %v405_v34 = vadd.f32 %v394_v30, %v385_v27 }
 0x116   : >> { %v425_v35 = vsub.f32 %v403_v25, %v414_v32  ;;  %v426_v36 = vsub.f32 %v404_v21, %v416_v33 }
 0x117   : >> { %v417_v38 = vrot.slane %v405_v34, 7  ;;  %166 = sbr.rel (!%p164_p7) target bundleno = 58 (0x3a), region = 73 }
 0x118   : >> { %434 = vst.msk [vmem:[%s922_s4 + $0x7] sm:$0xff] %vm433_vm2, %v425_v35  ;;  %435 = vst.msk [vmem:[%s922_s4 + $0xf] sm:$0xff] %vm433_vm2, %v426_v36  ;;  %v396_v39 = vpop.permute.xlu0 %395 }
 0x119   : >> { %v418_v40 = vsel %vm411_vm1, %v415_v19, %v417_v38  ;;  %v406_v41 = vadd.f32 %v396_v39, %v386_v37 }
 0x11a   : >> { %v427_v42 = vsub.f32 %v405_v34, %v418_v40 }
 0x11b   : >> { %v428_v43 = vsub.f32 %v406_v41, %v417_v38 }
 0x11c   : >> { %436 = vst.msk [vmem:[%s922_s4 + $0x17] sm:$0xff] %vm433_vm2, %v427_v42 }
 0x11d   : >> { %438 = vst.msk [vmem:[%s922_s4 + $0x1f] sm:$0x1] %vm437_vm3, %v428_v43 }
 0x11e PF: > { %p11_p9 = scmp.ge.s32.totalorder %s755_s11, 4   ;;  %s956_s6 = smov %s701_s7 }
 0x11f   : > { %s957_s7 = smov %s705_s8  ;;  %s958_s8 = smov %s765_s14 }
 0x120   : > { %s959_s9 = smov %s755_s11  ;;  %13 = sbr.rel (!%p11_p9) target bundleno = 3 (0x3), region = 84 }
 0x127   :  { %463 = vsyncpa [#allocation3], 1 }
 0x128   :  { %465 = vsyncpa [#allocation3 + $0x1], 1 }

</bundles_post_ra>
